<compile_context>
chip_gen: v7x
topology: tpu7x:2x2x1
jax: 0.10.0
libtpu: 0.0.40
codegen_flags: <defaults>
</compile_context>

<pallas_src>
import jax
import jax.numpy as jnp
from jax.experimental import pallas as pl
from jax.experimental.pallas import tpu as pltpu


def _round_up(v, m):
    return ((v + m - 1) // m) * m


def stf_kernel(x_ref, w_ref, b_ref, alpha_ref, o_ref):
    # x_ref: [B, C, HW_blk] (compute dtype), w_ref: [C_out, C_in] (torch layout),
    # b_ref: [C_out, 1] f32, alpha_ref: [1, 1] in SMEM, o_ref: [B, C, HW_blk] f32.
    x = x_ref[...]
    w = w_ref[...]
    bias = b_ref[...]
    alpha = alpha_ref[0, 0]
    # One grid step covers the whole (padded) tensor; the batch dim is tiny and
    # static, so unroll it — each iteration is a 2-D channel matmul (the 1x1 conv),
    # f32 accumulation on the MXU, then fused PReLU + identity shortcut.
    for bi in range(x.shape[0]):
        xb = x[bi]                                                   # [C, HW_blk]
        y = jnp.dot(w, xb, preferred_element_type=jnp.float32) + bias
        act = jnp.where(y > 0.0, y, alpha * y)                       # shared-slope PReLU
        o_ref[bi] = (act + xb.astype(jnp.float32)).astype(o_ref.dtype)


def spatial_temporal_fusion(x, weight, bias, alpha, *,
                            compute_dtype=jnp.bfloat16,
                            max_block_bytes=4 << 20):
    """x: [B, C, H, W]; weight: [C, C] (torch Conv2d 1x1 [out, in] layout); bias: [C];
    alpha: scalar PReLU slope.  Returns squeeze(PReLU(conv1x1(x)) + x) in f32.

    compute_dtype controls the HBM-side input/weight dtype (bf16 halves read bytes;
    accumulation and output are always f32)."""
    b, c, h, w = x.shape
    hw = h * w

    x_flat = x.reshape(b, c, hw).astype(compute_dtype)   # free reshape, no transpose
    w_in = weight.astype(compute_dtype)                  # keep torch [out, in] layout
    bias_col = bias.reshape(c, 1).astype(jnp.float32)
    alpha_arr = jnp.full((1, 1), alpha, dtype=jnp.float32)

    # Lane-dense blocking over HW with a VMEM budget (keeps blocks small enough for
    # v7x's 64 MiB VMEM as spatial sizes grow; one tile at small shapes).
    in_itemsize = jnp.dtype(compute_dtype).itemsize
    bytes_per_lane = b * c * (in_itemsize + 4)           # input block + f32 output block
    max_lanes = max(128, (max_block_bytes // bytes_per_lane) // 128 * 128)
    hw_blk = min(_round_up(hw, 128), max_lanes)          # multiple of 128 -> unmasked vst
    hw_pad = _round_up(hw, hw_blk)
    if hw_pad != hw:
        x_flat = jnp.pad(x_flat, ((0, 0), (0, 0), (0, hw_pad - hw)))
    num_tiles = hw_pad // hw_blk

    out_flat = pl.pallas_call(
        stf_kernel,
        out_shape=jax.ShapeDtypeStruct((b, c, hw_pad), jnp.float32),
        grid=(num_tiles,),
        in_specs=[
            pl.BlockSpec((b, c, hw_blk), lambda i: (0, 0, i)),
            pl.BlockSpec((c, c), lambda i: (0, 0)),      # resident constants: same
            pl.BlockSpec((c, 1), lambda i: (0, 0)),      # block index every step
            pl.BlockSpec((1, 1), lambda i: (0, 0),
                         memory_space=pltpu.MemorySpace.SMEM),
        ],
        out_specs=pl.BlockSpec((b, c, hw_blk), lambda i: (0, 0, i)),
        compiler_params=pltpu.CompilerParams(
            # Only meaningful when num_tiles > 1 (v7x megacore split over HW tiles);
            # with one tile the grid is a single step on every generation.
            dimension_semantics=("parallel",)),
        cost_estimate=pl.CostEstimate(
            flops=2 * b * c * c * hw_pad + 4 * b * c * hw_pad,
            transcendentals=0,
            bytes_accessed=b * c * hw_pad * (in_itemsize + 4)
                           + c * c * in_itemsize + c * 4),
    )(x_flat, w_in, bias_col, alpha_arr)

    out = out_flat[:, :, :hw].reshape(b, c, h, w)
    # x.squeeze() in the PyTorch module (drops all size-1 dims, e.g. batch=1).
    return jnp.squeeze(out)


if __name__ == "__main__":
    # obs_len = 8 channels (module default), small spatial grid, small batch.
    B, C, H, W = 2, 8, 16, 16

    key = jax.random.PRNGKey(0)
    kx, kw, kb = jax.random.split(key, 3)

    x = jax.random.normal(kx, (B, C, H, W), dtype=jnp.float32)
    # nn.Conv2d(C, C, 1) init: uniform(-1/sqrt(fan_in), 1/sqrt(fan_in)), fan_in = C*1*1
    bound = 1.0 / (C ** 0.5)
    weight = jax.random.uniform(kw, (C, C), dtype=jnp.float32,
                                minval=-bound, maxval=bound)
    bias = jax.random.uniform(kb, (C,), dtype=jnp.float32,
                              minval=-bound, maxval=bound)
    alpha = 0.25  # nn.PReLU() default

    # Pure-JAX reference of the PyTorch forward (f32).
    ref = jnp.einsum('oc,bchw->bohw', weight, x) + bias[None, :, None, None]
    ref = jnp.where(ref > 0, ref, alpha * ref) + x
    ref = jnp.squeeze(ref)

    # f32 path: exact semantics of the (f32) torch module.
    out_f32 = spatial_temporal_fusion(x, weight, bias, alpha,
                                      compute_dtype=jnp.float32)
    jax.block_until_ready(out_f32)
    assert out_f32.shape == ref.shape
    assert jnp.allclose(out_f32, ref, atol=1e-5, rtol=1e-5)

    # bf16-input fast path: halves HBM read bytes; f32 accumulation + f32 output
    # (looser tolerance vs. the f32 reference, as flagged in the review).
    out_bf16 = spatial_temporal_fusion(x, weight, bias, alpha,
                                       compute_dtype=jnp.bfloat16)
    jax.block_until_ready(out_bf16)
    assert out_bf16.shape == ref.shape
    assert jnp.allclose(out_bf16, ref, atol=5e-2, rtol=5e-2)

    print("KERNEL_OK")
</pallas_src>

<mosaic_0001>
module attributes {stable_mosaic.version = 11 : i64} {
  func.func @stf_kernel(%arg0: i32, %arg1: memref<2x8x256xf32, #tpu.memory_space<vmem>>, %arg2: memref<8x8xf32, #tpu.memory_space<vmem>>, %arg3: memref<8x1xf32, #tpu.memory_space<vmem>>, %arg4: memref<1x1xf32, #tpu.memory_space<smem>>, %arg5: memref<2x8x256xf32, #tpu.memory_space<vmem>>) attributes {dimension_semantics = [#tpu.dimension_semantics<parallel>], iteration_bounds = array<i64: 1>, scalar_prefetch = 0 : i64, scratch_operands = 0 : i64, tpu.core_type = #tpu.core_type<tc>, window_params = [{transform_indices = @transform_0, window_bounds = array<i64: 2, 8, 256>}, {pipeline_mode = #tpu.pipeline_mode<synchronous>, transform_indices = @transform_1, window_bounds = array<i64: 8, 8>}, {pipeline_mode = #tpu.pipeline_mode<synchronous>, transform_indices = @transform_2, window_bounds = array<i64: 8, 1>}, {transform_indices = @transform_3, window_bounds = array<i64: 1, 1>}, {transform_indices = @transform_4, window_bounds = array<i64: 2, 8, 256>}]} {
    %c0 = arith.constant 0 : index
    %c0_0 = arith.constant 0 : index
    %c0_1 = arith.constant 0 : index
    %0 = vector.load %arg1[%c0, %c0_0, %c0_1] : memref<2x8x256xf32, #tpu.memory_space<vmem>>, vector<2x8x256xf32>
    %c0_2 = arith.constant 0 : index
    %c0_3 = arith.constant 0 : index
    %1 = vector.load %arg2[%c0_2, %c0_3] : memref<8x8xf32, #tpu.memory_space<vmem>>, vector<8x8xf32>
    %c0_4 = arith.constant 0 : index
    %c0_5 = arith.constant 0 : index
    %2 = vector.load %arg3[%c0_4, %c0_5] : memref<8x1xf32, #tpu.memory_space<vmem>>, vector<8x1xf32>
    %c0_6 = arith.constant 0 : index
    %c0_7 = arith.constant 0 : index
    %3 = memref.load %arg4[%c0_6, %c0_7] : memref<1x1xf32, #tpu.memory_space<smem>>
    %4 = vector.extract_strided_slice %0 {offsets = [0, 0, 0], sizes = [1, 8, 256], strides = [1, 1, 1]} : vector<2x8x256xf32> to vector<1x8x256xf32>
    %5 = vector.shape_cast %4 : vector<1x8x256xf32> to vector<8x256xf32>
    %cst = arith.constant dense<0.000000e+00> : vector<8x256xf32>
    %6 = tpu.matmul %1, %5, %cst {dimension_numbers = #tpu.dot_dimension_numbers<[1], [0], [0], [1], [0, 0, 1, 1], [], []>} : vector<8x8xf32>, vector<8x256xf32>, vector<8x256xf32> -> vector<8x256xf32>
    %7 = vector.broadcast %2 : vector<8x1xf32> to vector<8x256xf32>
    %8 = arith.addf %6, %7 : vector<8x256xf32>
    %cst_8 = arith.constant 0.000000e+00 : f32
    %9 = vector.broadcast %cst_8 : f32 to vector<8x256xf32>
    %10 = arith.cmpf ogt, %8, %9 : vector<8x256xf32>
    %11 = vector.broadcast %3 : f32 to vector<8x256xf32>
    %12 = arith.mulf %11, %8 : vector<8x256xf32>
    %13 = arith.select %10, %8, %12 : vector<8x256xi1>, vector<8x256xf32>
    %14 = arith.addf %13, %5 : vector<8x256xf32>
    %c0_9 = arith.constant 0 : index
    %c0_10 = arith.constant 0 : index
    %c0_11 = arith.constant 0 : index
    %15 = vector.load %arg5[%c0_9, %c0_10, %c0_11] : memref<2x8x256xf32, #tpu.memory_space<vmem>>, vector<1x8x256xf32>
    %16 = vector.shape_cast %15 : vector<1x8x256xf32> to vector<8x256xf32>
    %17 = vector.shape_cast %14 : vector<8x256xf32> to vector<1x8x256xf32>
    tpu.vector_store %arg5[%c0_9, %c0_10, %c0_11], %17 {strides = array<i32>} : memref<2x8x256xf32, #tpu.memory_space<vmem>>, vector<1x8x256xf32>,
    %18 = vector.extract_strided_slice %0 {offsets = [1, 0, 0], sizes = [1, 8, 256], strides = [1, 1, 1]} : vector<2x8x256xf32> to vector<1x8x256xf32>
    %19 = vector.shape_cast %18 : vector<1x8x256xf32> to vector<8x256xf32>
    %cst_12 = arith.constant dense<0.000000e+00> : vector<8x256xf32>
    %20 = tpu.matmul %1, %19, %cst_12 {dimension_numbers = #tpu.dot_dimension_numbers<[1], [0], [0], [1], [0, 0, 1, 1], [], []>} : vector<8x8xf32>, vector<8x256xf32>, vector<8x256xf32> -> vector<8x256xf32>
    %21 = vector.broadcast %2 : vector<8x1xf32> to vector<8x256xf32>
    %22 = arith.addf %20, %21 : vector<8x256xf32>
    %cst_13 = arith.constant 0.000000e+00 : f32
    %23 = vector.broadcast %cst_13 : f32 to vector<8x256xf32>
    %24 = arith.cmpf ogt, %22, %23 : vector<8x256xf32>
    %25 = vector.broadcast %3 : f32 to vector<8x256xf32>
    %26 = arith.mulf %25, %22 : vector<8x256xf32>
    %27 = arith.select %24, %22, %26 : vector<8x256xi1>, vector<8x256xf32>
    %28 = arith.addf %27, %19 : vector<8x256xf32>
    %c1 = arith.constant 1 : index
    %c0_14 = arith.constant 0 : index
    %c0_15 = arith.constant 0 : index
    %29 = vector.load %arg5[%c1, %c0_14, %c0_15] : memref<2x8x256xf32, #tpu.memory_space<vmem>>, vector<1x8x256xf32>
    %30 = vector.shape_cast %29 : vector<1x8x256xf32> to vector<8x256xf32>
    %31 = vector.shape_cast %28 : vector<8x256xf32> to vector<1x8x256xf32>
    tpu.vector_store %arg5[%c1, %c0_14, %c0_15], %31 {strides = array<i32>} : memref<2x8x256xf32, #tpu.memory_space<vmem>>, vector<1x8x256xf32>,
    return
  }
  func.func @transform_0(%arg0: i32) -> (i32, i32, i32) {
    %c0_i32 = arith.constant 0 : i32
    %c0_i32_0 = arith.constant 0 : i32
    %c0_i32_1 = arith.constant 0 : i32
    return %c0_i32, %c0_i32_0, %arg0 : i32, i32, i32
  }
  func.func @transform_1(%arg0: i32) -> (i32, i32) {
    %c0_i32 = arith.constant 0 : i32
    %c0_i32_0 = arith.constant 0 : i32
    %c0_i32_1 = arith.constant 0 : i32
    return %c0_i32, %c0_i32_0 : i32, i32
  }
  func.func @transform_2(%arg0: i32) -> (i32, i32) {
    %c0_i32 = arith.constant 0 : i32
    %c0_i32_0 = arith.constant 0 : i32
    %c0_i32_1 = arith.constant 0 : i32
    return %c0_i32, %c0_i32_0 : i32, i32
  }
  func.func @transform_3(%arg0: i32) -> (i32, i32) {
    %c0_i32 = arith.constant 0 : i32
    %c0_i32_0 = arith.constant 0 : i32
    %c0_i32_1 = arith.constant 0 : i32
    return %c0_i32, %c0_i32_0 : i32, i32
  }
  func.func @transform_4(%arg0: i32) -> (i32, i32, i32) {
    %c0_i32 = arith.constant 0 : i32
    %c0_i32_0 = arith.constant 0 : i32
    %c0_i32_1 = arith.constant 0 : i32
    return %c0_i32, %c0_i32_0, %arg0 : i32, i32, i32
  }
}

</mosaic_0001>

<bundles_post_ra>
// kernel: tpu_custom_call.1
= control target key start
LH: loop header
LB: loop body
LE: loop exit
PB: predicated region body
PF: predicated region fallthrough
CT: control target
= control target key end

     0   :  { %10 = vsyncpa [#allocation4], 0  ;;  %s357_s0 = inlined_call_operand.hbm [shape: f32[2,8,256], index: 0, kind: input, shape index: {}]   ;;  %s358_s1 = inlined_call_operand.vmem [shape: f32[8,8], index: 1, kind: input, shape index: {}]   ;;  %s359_s2 = inlined_call_operand.vmem [shape: f32[8,1], index: 2, kind: input, shape index: {}]   ;;  %s360_s3 = inlined_call_operand.<no memory space> [shape: f32[1,1], index: 3, kind: input, shape index: {}]   ;;  %s361_s4 = inlined_call_operand.hbm [shape: f32[2,8,256], index: 4, kind: output, shape index: {}]  }
   0x1   :  { %11 = vsyncpa [#allocation5], 0  ;;  %s287_s15 = smov [#allocation3]   ;;  %s239_s19 = scalar_lea.hbm %s357_s0, 512 }
   0x2   :  { %s17_s16 = sshll.u32 %s287_s15, 4  ;;  %p240_p0 = scmp.ne.s32.totalorder %s357_s0, %s239_s19  ;;  %s18_s16 = int_to_ptr.vmem [resolvable:$true] %s17_s16 }
   0x3   :  { %p243_p1 = scmp.lt.u32.totalorder %s239_s19, %s357_s0 }
   0x5   :  { %p245_p2 = pnand %p243_p1, %p240_p0 }
   0x7   :  { %248 = shalt.err (!%p245_p2)
}
   0x8   :  { %s249_s24 = scalar_lea.vmem %s18_s16, 512  ;;  %p254_p4 = scmp.lt.s32.totalorder %s18_s16, %s18_s16 }
   0x9   :  { %p250_p3 = scmp.ne.s32.totalorder %s18_s16, %s249_s24  ;;  %p255_p5 = scmp.lt.s32.totalorder %s249_s24, %s249_s24 }
   0xb   :  { %p256_p6 = por %p255_p5, %p254_p4 }
   0xd   :  { %p257_p7 = pnand %p256_p6, %p250_p3 }
   0xf   :  { %260 = shalt.err (!%p257_p7)
}
  0x10   :  { %s288_s25 = smov 256   ;;  %s289_s26 = smov 16  }
  0x11   :  { %23 = dma.hbm_to_vmem [thread:$0]  %s357_s0, 512, %s18_s16, [#allocation4], %s288_s25, %s288_s25, %s289_s26  }
  0x12   :  { %283 = dma.done.wait [#allocation4], 512  }
  0x13   :  { %284 = vsyncadd [#allocation4], 4294966784  ;;  %v290_v0 = vmov 0.0   ;;  %v291_v1 = vmov 0   ;;  %v34_v2 = vld [vmem:[#allocation3 + $0x8] sm:$0xff]  ;;  %v36_v3 = vld [vmem:[#allocation3 + $0x18] sm:$0xff]  ;;  %v122_v10 = vstv %s360_s3 }
  0x14   :  { %113 = vmatprep.mubr.f32.mxu0 %v290_v0  ;;  %195 = vmatprep.mubr.f32.mxu1 %v290_v0  ;;  %v33_v4 = vld [vmem:[#allocation3] sm:$0xff]  ;;  %vm45_vm0 = vcmask 64512   ;;  %v35_v5 = vld [vmem:[#allocation3 + $0x10] sm:$0xff] }
  0x15   :  { %238 = vset.pattern.permute.xlu0 %v291_v1  ;;  %49 = vmatprep.subr.mxu0 %v34_v2  ;;  %v37_v6 = vld [vmem:[%s358_s1] sm:$0xff]  ;;  %s292_s1 = smov [#allocation6]  }
  0x16   :  { %131 = vmatprep.subr.mxu1 %v36_v3  ;;  %v38_v7 = vld [vmem:[%s359_s2] sm:$0xff]  ;;  %50 = vmatpush1.msra.mxu0 %v33_v4  ;;  %s218_s2 = sshll.u32 %s292_s1, 4  ;;  %s219_s2 = int_to_ptr.vmem [resolvable:$true] %s218_s2 }
  0x17   :  { %132 = vmatpush1.msra.mxu1 %v35_v5  ;;  %230 = vmatmul.mubr.msk.f32.vlgmr.msra.gmra.mrb[0].mxu0 %vm45_vm0, %v37_v6  ;;  %s261_s3 = scalar_lea.vmem %s219_s2, 512  ;;  %p266_p9 = scmp.lt.s32.totalorder %s219_s2, %s219_s2 }
  0x18   :  { %231 = vmatmul.mubr.msk.f32.vlgmr.msra.gmra.mrb[0].mxu1 %vm45_vm0, %v37_v6  ;;  %42 = vperm.xlu0 %238, %v38_v7   ;;  %p262_p8 = scmp.ne.s32.totalorder %s219_s2, %s261_s3  ;;  %p267_p10 = scmp.lt.s32.totalorder %s261_s3, %s261_s3 }
  0x1a   :  { %p268_p11 = por %p267_p10, %p266_p9 }
  0x1c   :  { %p269_p12 = pnand %p268_p11, %p262_p8 }
  0x97   :  { %v43_v8 = vpop.permute.xlu0 %42 }
  0xea   :  { %v115_v9 = vpop.f32.mrb[0].mxu0 }
  0xeb   :  { %v197_v11 = vpop.f32.mrb[0].mxu1  ;;  %v116_v12 = vadd.f32 %v115_v9, %v43_v8  ;;  %v117_v14 = vpop.f32.mrb[1].mxu0 }
  0xec   :  { %v198_v13 = vadd.f32 %v197_v11, %v43_v8  ;;  %v199_v15 = vpop.f32.mrb[1].mxu1  ;;  %v118_v16 = vadd.f32 %v117_v14, %v43_v8 }
  0xed   :  { %v200_v17 = vadd.f32 %v199_v15, %v43_v8  ;;  %vm120_vm1 = vcmp.gt.f32.partialorder %v116_v12, 0.0  ;;  %v123_v18 = vmul.f32 %v122_v10, %v116_v12 }
  0xee   :  { %vm202_vm2 = vcmp.gt.f32.partialorder %v198_v13, 0.0  ;;  %v204_v19 = vmul.f32 %v198_v13, %v122_v10  ;;  %vm121_vm3 = vcmp.gt.f32.partialorder %v118_v16, 0.0  ;;  %v124_v20 = vmul.f32 %v122_v10, %v118_v16 }
  0xef   :  { %vm203_vm4 = vcmp.gt.f32.partialorder %v200_v17, 0.0  ;;  %v205_v21 = vmul.f32 %v200_v17, %v122_v10  ;;  %v125_v22 = vsel %vm120_vm1, %v116_v12, %v123_v18 }
  0xf0   :  { %v206_v23 = vsel %vm202_vm2, %v198_v13, %v204_v19  ;;  %v127_v24 = vadd.f32 %v125_v22, %v33_v4  ;;  %v126_v26 = vsel %vm121_vm3, %v118_v16, %v124_v20 }
  0xf1   :  { %v208_v25 = vadd.f32 %v206_v23, %v35_v5  ;;  %v207_v27 = vsel %vm203_vm4, %v200_v17, %v205_v21  ;;  %v128_v28 = vadd.f32 %v126_v26, %v34_v2 }
  0xf2   :  { %v209_v29 = vadd.f32 %v207_v27, %v36_v3  ;;  %129 = vst [vmem:[#allocation6] sm:$0xff] %v127_v24 }
  0xf3   :  { %211 = vst [vmem:[#allocation6 + $0x10] sm:$0xff] %v208_v25  ;;  %130 = vst [vmem:[#allocation6 + $0x8] sm:$0xff] %v128_v28 }
  0xf4   :  { %212 = vst [vmem:[#allocation6 + $0x18] sm:$0xff] %v209_v29 }
  0xf5   :  { %272 = shalt.err (!%p269_p12)
}
  0xf6   :  { %s273_s10 = scalar_lea.hbm %s361_s4, 512 }
  0xf7   :  { %p274_p13 = scmp.ne.s32.totalorder %s361_s4, %s273_s10  ;;  %p277_p0 = scmp.lt.u32.totalorder %s273_s10, %s361_s4 }
  0xf9   :  { %p279_p1 = pnand %p277_p0, %p274_p13 }
  0xfb   :  { %282 = shalt.err (!%p279_p1)
}
  0xfc   :  { %224 = dma.vmem_to_hbm [thread:$0]  %s219_s2, 512, %s361_s4, [#allocation5], %s288_s25, %s288_s25, %s289_s26  }
  0xfd   :  { %285 = dma.done.wait [#allocation5], 512  }
  0xfe   :  { %286 = vsyncadd [#allocation5], 4294966784 }
  0xff   :  { %228 = vsyncpa [#allocation4], 1 }
 0x100   :  { %229 = vsyncpa [#allocation5], 1 }

</bundles_post_ra>
